<compile_context>
chip_gen: v7x
topology: tpu7x:2x2x1
jax: 0.10.0
libtpu: 0.0.40
codegen_flags: <defaults>
</compile_context>

<pallas_src>
import functools

import jax
import jax.numpy as jnp
from jax import lax
from jax.experimental import pallas as pl
from jax.experimental.pallas import tpu as pltpu


_LANE = 128
_VMEM_LIMIT_BYTES = 48 * 1024 * 1024   # explicit scoped-VMEM limit (safe on v5e/v6e/v7x)
_VMEM_TILE_BUDGET = 40 * 1024 * 1024   # what tile selection is allowed to occupy


def _round_up(x, m):
    return ((x + m - 1) // m) * m


def _largest_aligned_divisor(size, cap):
    """Largest multiple of 128 that divides `size` (a 128-multiple) and is <= cap."""
    best = _LANE
    t = _LANE
    while t <= cap:
        if size % t == 0:
            best = t
        t += _LANE
    return best


def _choose_tiles(m_pad, k_pad, tm_max, tk_max, *, fused):
    # Row tile: a divisor of m_pad (no extra M padding -> no wasted MXU FLOPs).
    # Prefer >= 2 row tiles so the "parallel" grid axis can shard across both
    # TensorCores on v7x; on 1-TC chips the extra row tile only costs one more
    # pass over the RHS slab, which the VMEM budget below keeps cheap.
    tm_cap = min(tm_max, m_pad if m_pad <= _LANE else max(_LANE, m_pad // 2))
    tm = _largest_aligned_divisor(m_pad, tm_cap)

    # K tile: a divisor of k_pad, capped so per-step VMEM residency
    #     2 * (m_pad * tk) bf16  (double-buffered RHS slab)
    #   + (tm * m_pad) f32 accumulator (+ target / output buffers when fused)
    # stays inside the budget (keeps double buffering alive on v7x's 64 MiB
    # and comfortably under the explicit scoped limit on v5e/v6e).
    fixed = tm * m_pad * 4 * (3 if fused else 2)
    rhs_budget = max(_VMEM_TILE_BUDGET - fixed, 2 * _LANE * m_pad * 2)
    tk_cap_vmem = rhs_budget // (2 * m_pad * 2)
    tk_cap = max(_LANE, min(tk_max, (tk_cap_vmem // _LANE) * _LANE))
    tk = _largest_aligned_divisor(k_pad, tk_cap)
    return tm, tk


def _pad_features(x, tm_max=256, tk_max=512, *, fused=True):
    """x: [N,C,H,W] -> (F_pad [m_pad,k_pad] bf16, m, m_pad, k_pad, tm, tk, scale).

    bf16 operands keep the MXU at native rate (f32 matmul is multi-pass
    emulation) and halve input HBM traffic; accumulation stays f32 via
    preferred_element_type in the kernels.
    """
    n, c, h, w = x.shape
    m = n * c
    k = h * w
    feats = x.reshape(m, k).astype(jnp.bfloat16)

    m_pad = _round_up(m, _LANE)
    k_pad = _round_up(k, _LANE)
    tm, tk = _choose_tiles(m_pad, k_pad, tm_max, tk_max, fused=fused)

    if (m_pad, k_pad) != (m, k):
        # TODO(synk): for shapes that are not 128-multiples this materializes a
        # padded copy of F in HBM; CompilerParams(allow_input_fusion=...) could
        # fuse the reshape/cast/pad into the kernel's input DMA instead.
        feats = jnp.pad(feats, ((0, m_pad - m), (0, k_pad - k)))

    scale = 1.0 / float(n * c * h * w)
    return feats, m, m_pad, k_pad, tm, tk, scale


# ----------------------------------------------------------------------------
# Gram-matrix kernel: the single input is the full-row (m_pad, tk) K-slab of
# F; the LHS row tile is a 128-aligned slice of that slab.  Accumulate
# F_tile @ F^T directly into the resident output block over the K grid axis;
# scale on the last K step.
# ----------------------------------------------------------------------------
def _gram_kernel(rhs_ref, g_ref, *, scale):
    k = pl.program_id(1)
    tm = g_ref.shape[0]

    @pl.when(k == 0)
    def _():
        g_ref[...] = jnp.zeros_like(g_ref)

    row_start = pl.multiple_of(pl.program_id(0) * tm, _LANE)
    lhs = rhs_ref[pl.ds(row_start, tm), :]
    # Contract dim 1 of both operands (MXU consumes the RHS transposed; no .T).
    g_ref[...] += lax.dot_general(
        lhs, rhs_ref[...],
        dimension_numbers=(((1,), (1,)), ((), ())),
        preferred_element_type=jnp.float32,
    )

    @pl.when(k == pl.num_programs(1) - 1)
    def _():
        g_ref[...] = g_ref[...] * scale


def _gram_padded(x, *, tm_max=256, tk_max=512):
    """Returns (G_pad [m_pad, m_pad] f32, m).  Padded rows/cols are zero."""
    feats, m, m_pad, k_pad, tm, tk, scale = _pad_features(
        x, tm_max, tk_max, fused=False)
    grid = (m_pad // tm, k_pad // tk)

    cost = pl.CostEstimate(
        flops=2 * m_pad * m_pad * k_pad,
        transcendentals=0,
        bytes_accessed=grid[0] * m_pad * k_pad * 2 + m_pad * m_pad * 4,
    )

    g_pad = pl.pallas_call(
        functools.partial(_gram_kernel, scale=scale),
        out_shape=jax.ShapeDtypeStruct((m_pad, m_pad), jnp.float32),
        grid_spec=pltpu.PrefetchScalarGridSpec(
            num_scalar_prefetch=0,
            grid=grid,
            in_specs=[
                pl.BlockSpec((m_pad, tk), lambda i, k: (0, k)),   # all rows of F
            ],
            out_specs=pl.BlockSpec((tm, m_pad), lambda i, k: (i, 0)),
        ),
        compiler_params=pltpu.CompilerParams(
            dimension_semantics=("parallel", "arbitrary"),
            vmem_limit_bytes=_VMEM_LIMIT_BYTES),
        cost_estimate=cost,
    )(feats)
    return g_pad, m


def gram_matrix(x, *, tm_max=256, tk_max=512):
    """x: [N, C, H, W] float -> G: [N*C, N*C] float32."""
    g_pad, m = _gram_padded(x, tm_max=tm_max, tk_max=tk_max)
    return g_pad[:m, :m]


# ----------------------------------------------------------------------------
# Fused gram + MSE kernel: accumulate the gram row-block in a VMEM scratch,
# then on the last K step emit sum((G_tile - target_tile)^2) per row-tile.
# G is never written to HBM.
# ----------------------------------------------------------------------------
def _style_loss_kernel(rhs_ref, tgt_ref, loss_ref, acc_ref, *, scale):
    k = pl.program_id(1)
    tm = acc_ref.shape[0]

    @pl.when(k == 0)
    def _():
        acc_ref[...] = jnp.zeros_like(acc_ref)

    row_start = pl.multiple_of(pl.program_id(0) * tm, _LANE)
    lhs = rhs_ref[pl.ds(row_start, tm), :]
    acc_ref[...] += lax.dot_general(
        lhs, rhs_ref[...],
        dimension_numbers=(((1,), (1,)), ((), ())),
        preferred_element_type=jnp.float32,
    )

    @pl.when(k == pl.num_programs(1) - 1)
    def _():
        d = acc_ref[...] * scale - tgt_ref[...]
        # Padded rows/cols are zero in both operands, so they contribute 0.
        loss_ref[...] = jnp.broadcast_to(jnp.sum(d * d), loss_ref.shape)


def style_loss(x, target_gram_padded, *, tm_max=256, tk_max=512):
    """MSE(gram(x), target) where target_gram_padded is [m_pad, m_pad] f32."""
    feats, m, m_pad, k_pad, tm, tk, scale = _pad_features(
        x, tm_max, tk_max, fused=True)
    assert target_gram_padded.shape == (m_pad, m_pad), (
        "target gram padding does not match input feature shape")
    grid = (m_pad // tm, k_pad // tk)
    n_m = grid[0]

    cost = pl.CostEstimate(
        flops=2 * m_pad * m_pad * k_pad,
        transcendentals=0,
        bytes_accessed=(n_m * m_pad * k_pad * 2
                        + m_pad * m_pad * 4 + n_m * 128 * 4),
    )

    partial = pl.pallas_call(
        functools.partial(_style_loss_kernel, scale=scale),
        out_shape=jax.ShapeDtypeStruct((n_m, 1, 128), jnp.float32),
        grid_spec=pltpu.PrefetchScalarGridSpec(
            num_scalar_prefetch=0,
            grid=grid,
            in_specs=[
                pl.BlockSpec((m_pad, tk), lambda i, k: (0, k)),   # all rows of F
                pl.BlockSpec((tm, m_pad), lambda i, k: (i, 0)),   # target row tile
            ],
            out_specs=pl.BlockSpec((1, 1, 128), lambda i, k: (i, 0, 0)),
            scratch_shapes=[pltpu.VMEM((tm, m_pad), jnp.float32)],
        ),
        compiler_params=pltpu.CompilerParams(
            dimension_semantics=("parallel", "arbitrary"),
            vmem_limit_bytes=_VMEM_LIMIT_BYTES),
        cost_estimate=cost,
    )(feats, target_gram_padded.astype(jnp.float32))

    # Mean over the true (unpadded) M x M gram elements.
    return jnp.sum(partial[:, 0, 0]) / float(m * m)


# ----------------------------------------------------------------------------
# StyleLoss "module": target gram fixed at construction; forward computes the
# loss as a side value and passes the input through unchanged.
# ----------------------------------------------------------------------------
class StyleLoss:
    def __init__(self, target_feature):
        g_pad, m = _gram_padded(target_feature)
        self._target_padded = lax.stop_gradient(g_pad)
        self._m = m
        self.target = self._target_padded[:m, :m]   # matches PyTorch attribute
        self.loss = None

    def __call__(self, x):
        self.loss = style_loss(x, self._target_padded)
        return x


if __name__ == "__main__":
    key = jax.random.PRNGKey(0)
    k_tgt, k_in = jax.random.split(key)

    # small NCHW conv-feature-map shapes
    target_feature = jax.random.normal(k_tgt, (2, 4, 16, 16), dtype=jnp.float32)
    x = jax.random.normal(k_in, (2, 4, 16, 16), dtype=jnp.float32)

    style = StyleLoss(target_feature)
    out = style(x)

    out = jax.block_until_ready(out)
    loss = jax.block_until_ready(style.loss)
    g_pallas = jax.block_until_ready(gram_matrix(x))

    # Reference that mirrors the kernel arithmetic (bf16 operands, f32 acc).
    def ref_gram_bf16(v):
        n, c, h, w = v.shape
        f = v.reshape(n * c, h * w).astype(jnp.bfloat16)
        g = lax.dot_general(f, f, (((1,), (1,)), ((), ())),
                            preferred_element_type=jnp.float32)
        return g / float(n * c * h * w)

    # Pure-f32 reference (loose check only: inputs were rounded to bf16).
    def ref_gram_f32(v):
        n, c, h, w = v.shape
        f = v.reshape(n * c, h * w).astype(jnp.float32)
        return (f @ f.T) / float(n * c * h * w)

    ref_g = ref_gram_bf16(x)
    ref_loss = jnp.mean((ref_g - ref_gram_bf16(target_feature)) ** 2)

    assert jnp.allclose(out, x)
    assert jnp.allclose(g_pallas, ref_g, rtol=1e-3, atol=1e-6)
    assert jnp.allclose(loss, ref_loss, rtol=2e-3, atol=1e-7)
    # bf16-input precision sanity check against the full-f32 math.
    assert jnp.allclose(g_pallas, ref_gram_f32(x), rtol=5e-2, atol=5e-3)

    print("KERNEL_OK")
</pallas_src>

<mosaic_0001>
module attributes {stable_mosaic.version = 11 : i64} {
  func.func @_gram_kernel(%arg0: i32, %arg1: i32, %arg2: memref<128x256xbf16, #tpu.memory_space<vmem>>, %arg3: memref<128x128xf32, #tpu.memory_space<vmem>>) attributes {dimension_semantics = [#tpu.dimension_semantics<parallel>, #tpu.dimension_semantics<arbitrary>], iteration_bounds = array<i64: 1, 1>, scalar_prefetch = 0 : i64, scratch_operands = 0 : i64, tpu.core_type = #tpu.core_type<tc>, window_params = [{transform_indices = @transform_0, window_bounds = array<i64: 128, 256>}, {transform_indices = @transform_1, window_bounds = array<i64: 128, 128>}]} {
    %c0_i32 = arith.constant 0 : i32
    %0 = arith.cmpi eq, %arg1, %c0_i32 : i32
    %1 = arith.extui %0 : i1 to i32
    %c0_i32_0 = arith.constant 0 : i32
    %2 = arith.cmpi ne, %1, %c0_i32_0 : i32
    scf.if %2 {
      %cst_9 = arith.constant 0.000000e+00 : f32
      %15 = vector.broadcast %cst_9 : f32 to vector<128x128xf32>
      %c0_10 = arith.constant 0 : index
      %c0_11 = arith.constant 0 : index
      %16 = vector.load %arg3[%c0_10, %c0_11] : memref<128x128xf32, #tpu.memory_space<vmem>>, vector<128x128xf32>
      tpu.vector_store %arg3[%c0_10, %c0_11], %15 {strides = array<i32>} : memref<128x128xf32, #tpu.memory_space<vmem>>, vector<128x128xf32>,
    } else {
    }
    %c128_i32 = arith.constant 128 : i32
    %3 = arith.muli %arg0, %c128_i32 : i32
    %4 = tpu.assume_multiple %3, 128 : i32
    %5 = arith.index_cast %4 : i32 to index
    %c0 = arith.constant 0 : index
    %6 = vector.load %arg2[%5, %c0] : memref<128x256xbf16, #tpu.memory_space<vmem>>, vector<128x256xbf16>
    %c0_1 = arith.constant 0 : index
    %c0_2 = arith.constant 0 : index
    %7 = vector.load %arg3[%c0_1, %c0_2] : memref<128x128xf32, #tpu.memory_space<vmem>>, vector<128x128xf32>
    %c0_3 = arith.constant 0 : index
    %c0_4 = arith.constant 0 : index
    %8 = vector.load %arg2[%c0_3, %c0_4] : memref<128x256xbf16, #tpu.memory_space<vmem>>, vector<128x256xbf16>
    %cst = arith.constant dense<0.000000e+00> : vector<128x128xf32>
    %9 = tpu.matmul %6, %8, %cst {dimension_numbers = #tpu.dot_dimension_numbers<[1], [1], [0], [0], [0, 0, 1, 0], [], []>} : vector<128x256xbf16>, vector<128x256xbf16>, vector<128x128xf32> -> vector<128x128xf32>
    %10 = arith.addf %7, %9 : vector<128x128xf32>
    %c0_5 = arith.constant 0 : index
    %c0_6 = arith.constant 0 : index
    %11 = vector.load %arg3[%c0_5, %c0_6] : memref<128x128xf32, #tpu.memory_space<vmem>>, vector<128x128xf32>
    tpu.vector_store %arg3[%c0_5, %c0_6], %10 {strides = array<i32>} : memref<128x128xf32, #tpu.memory_space<vmem>>, vector<128x128xf32>,
    %c0_i32_7 = arith.constant 0 : i32
    %12 = arith.cmpi eq, %arg1, %c0_i32_7 : i32
    %13 = arith.extui %12 : i1 to i32
    %c0_i32_8 = arith.constant 0 : i32
    %14 = arith.cmpi ne, %13, %c0_i32_8 : i32
    scf.if %14 {
      %c0_9 = arith.constant 0 : index
      %c0_10 = arith.constant 0 : index
      %15 = vector.load %arg3[%c0_9, %c0_10] : memref<128x128xf32, #tpu.memory_space<vmem>>, vector<128x128xf32>
      %cst_11 = arith.constant 4.8828125E-4 : f32
      %16 = vector.broadcast %cst_11 : f32 to vector<128x128xf32>
      %17 = arith.mulf %15, %16 : vector<128x128xf32>
      %c0_12 = arith.constant 0 : index
      %c0_13 = arith.constant 0 : index
      %18 = vector.load %arg3[%c0_12, %c0_13] : memref<128x128xf32, #tpu.memory_space<vmem>>, vector<128x128xf32>
      tpu.vector_store %arg3[%c0_12, %c0_13], %17 {strides = array<i32>} : memref<128x128xf32, #tpu.memory_space<vmem>>, vector<128x128xf32>,
    } else {
    }
    return
  }
  func.func @transform_0(%arg0: i32, %arg1: i32) -> (i32, i32) {
    %c0_i32 = arith.constant 0 : i32
    %c0_i32_0 = arith.constant 0 : i32
    return %c0_i32, %arg1 : i32, i32
  }
  func.func @transform_1(%arg0: i32, %arg1: i32) -> (i32, i32) {
    %c0_i32 = arith.constant 0 : i32
    %c0_i32_0 = arith.constant 0 : i32
    return %arg0, %c0_i32 : i32, i32
  }
}

</mosaic_0001>

<bundles_post_ra>
// kernel: tpu_custom_call.1
= control target key start
LH: loop header
LB: loop body
LE: loop exit
PB: predicated region body
PF: predicated region fallthrough
CT: control target
= control target key end

     0   :  { %6 = vsyncpa [#allocation3], 0  ;;  %s626_s0 = inlined_call_operand.hbm [shape: bf16[128,256], index: 0, kind: input, shape index: {}]   ;;  %s627_s1 = inlined_call_operand.hbm [shape: f32[128,128], index: 1, kind: output, shape index: {}]  }
   0x1   :  { %7 = vsyncpa [#allocation4], 0  ;;  %s582_s6 = smov [#allocation2]   ;;  %s534_s10 = scalar_lea.hbm %s626_s0, 2048 }
   0x2   :  { %s13_s7 = sshll.u32 %s582_s6, 4  ;;  %p535_p0 = scmp.ne.s32.totalorder %s626_s0, %s534_s10  ;;  %s14_s7 = int_to_ptr.vmem [resolvable:$true] %s13_s7 }
   0x3   :  { %p538_p1 = scmp.lt.u32.totalorder %s534_s10, %s626_s0 }
   0x5   :  { %p540_p2 = pnand %p538_p1, %p535_p0 }
   0x7   :  { %543 = shalt.err (!%p540_p2)
}
   0x8   :  { %s544_s15 = scalar_lea.vmem %s14_s7, 2048  ;;  %p549_p4 = scmp.lt.s32.totalorder %s14_s7, %s14_s7 }
   0x9   :  { %p545_p3 = scmp.ne.s32.totalorder %s14_s7, %s544_s15  ;;  %p550_p5 = scmp.lt.s32.totalorder %s544_s15, %s544_s15 }
   0xb   :  { %p551_p6 = por %p550_p5, %p549_p4 }
   0xd   :  { %p552_p7 = pnand %p551_p6, %p545_p3 }
   0xf   :  { %555 = shalt.err (!%p552_p7)
}
  0x10   :  { %s583_s16 = smov 128   ;;  %s584_s17 = smov 8  }
  0x11   :  { %19 = dma.hbm_to_vmem [thread:$0]  %s626_s0, 2048, %s14_s7, [#allocation3], %s583_s16, %s583_s16, %s584_s17  }
  0x12   :  { %578 = dma.done.wait [#allocation3], 2048  }
  0x13   :  { %579 = vsyncadd [#allocation3], 4294965248  ;;  %v510_v0 = vld [vmem:[#allocation2 + $0x4] ss:$8 sps:$4 sm:$0xff]   ;;  %v512_v1 = vld [vmem:[#allocation2] ss:$8 sps:$4 sm:$0xff]  }
  0x14   :  { %258 = vmatprep.subr.bf16.mxu0 %v510_v0  ;;  %489 = vmatprep.subr.bf16.mxu1 %v510_v0  ;;  %v513_v2 = vld [vmem:[#allocation2 + $0x14] ss:$8 sps:$4 sm:$0xff]   ;;  %v522_v3 = vld [vmem:[#allocation2 + $0x44] ss:$8 sps:$4 sm:$0xff]   ;;  %v515_v4 = vld [vmem:[#allocation2 + $0x10] ss:$8 sps:$4 sm:$0xff]  }
  0x15   :  { %259 = vmatpush1.bf16.xpose.msra.mxu0 %v512_v1  ;;  %497 = vmatpush1.bf16.xpose.msra.mxu1 %v512_v1  ;;  %v516_v5 = vld [vmem:[#allocation2 + $0x24] ss:$8 sps:$4 sm:$0xff]   ;;  %v518_v6 = vld [vmem:[#allocation2 + $0x20] ss:$8 sps:$4 sm:$0xff]   ;;  %v519_v7 = vld [vmem:[#allocation2 + $0x34] ss:$8 sps:$4 sm:$0xff]  }
  0x16   :  { %260 = vmatprep.subr.bf16.mxu0 %v513_v2  ;;  %490 = vmatprep.subr.bf16.mxu1 %v513_v2  ;;  %v521_v8 = vld [vmem:[#allocation2 + $0x30] ss:$8 sps:$4 sm:$0xff]   ;;  %v524_v9 = vld [vmem:[#allocation2 + $0x40] ss:$8 sps:$4 sm:$0xff]   ;;  %v525_v10 = vld [vmem:[#allocation2 + $0x54] ss:$8 sps:$4 sm:$0xff]  }
  0x17   :  { %290 = vmatprep.mubr.bf16.mxu0 %v510_v0  ;;  %322 = vmatprep.mubr.bf16.mxu1 %v522_v3  ;;  %v527_v11 = vld [vmem:[#allocation2 + $0x50] ss:$8 sps:$4 sm:$0xff]   ;;  %v528_v12 = vld [vmem:[#allocation2 + $0x64] ss:$8 sps:$4 sm:$0xff]   ;;  %v530_v13 = vld [vmem:[#allocation2 + $0x60] ss:$8 sps:$4 sm:$0xff]  }
  0x18   :  { %v531_v14 = vld [vmem:[#allocation2 + $0x74] ss:$8 sps:$4 sm:$0xff]   ;;  %v533_v15 = vld [vmem:[#allocation2 + $0x70] ss:$8 sps:$4 sm:$0xff]   ;;  %s585_s0 = smov [#allocation5]  }
  0x19   :  { %s443_s20 = sshll.u32 %s585_s0, 4  ;;  %s444_s20 = int_to_ptr.vmem [resolvable:$true] %s443_s20 }
  0x1a   :  { %s556_s21 = scalar_lea.vmem %s444_s20, 2048  ;;  %p561_p9 = scmp.lt.s32.totalorder %s444_s20, %s444_s20 }
  0x1b   :  { %p557_p8 = scmp.ne.s32.totalorder %s444_s20, %s556_s21  ;;  %p562_p10 = scmp.lt.s32.totalorder %s556_s21, %s556_s21 }
  0x1d   :  { %261 = vmatpush1.bf16.xpose.msra.mxu0 %v515_v4  ;;  %498 = vmatpush1.bf16.xpose.msra.mxu1 %v515_v4  ;;  %p563_p11 = por %p562_p10, %p561_p9 }
  0x1e   :  { %262 = vmatprep.subr.bf16.mxu0 %v516_v5  ;;  %491 = vmatprep.subr.bf16.mxu1 %v516_v5 }
  0x1f   :  { %p564_p12 = pnand %p563_p11, %p557_p8 }
  0x25   :  { %263 = vmatpush1.bf16.xpose.msra.mxu0 %v518_v6  ;;  %499 = vmatpush1.bf16.xpose.msra.mxu1 %v518_v6 }
  0x26   :  { %264 = vmatprep.subr.bf16.mxu0 %v519_v7  ;;  %492 = vmatprep.subr.bf16.mxu1 %v519_v7 }
  0x2d   :  { %265 = vmatpush1.bf16.xpose.msra.mxu0 %v521_v8  ;;  %500 = vmatpush1.bf16.xpose.msra.mxu1 %v521_v8 }
  0x2e   :  { %266 = vmatprep.subr.bf16.mxu0 %v522_v3  ;;  %493 = vmatprep.subr.bf16.mxu1 %v522_v3 }
  0x35   :  { %267 = vmatpush1.bf16.xpose.msra.mxu0 %v524_v9  ;;  %501 = vmatpush1.bf16.xpose.msra.mxu1 %v524_v9 }
  0x36   :  { %268 = vmatprep.subr.bf16.mxu0 %v525_v10  ;;  %494 = vmatprep.subr.bf16.mxu1 %v525_v10 }
  0x3d   :  { %269 = vmatpush1.bf16.xpose.msra.mxu0 %v527_v11  ;;  %502 = vmatpush1.bf16.xpose.msra.mxu1 %v527_v11 }
  0x3e   :  { %270 = vmatprep.subr.bf16.mxu0 %v528_v12  ;;  %495 = vmatprep.subr.bf16.mxu1 %v528_v12 }
  0x45   :  { %271 = vmatpush1.bf16.xpose.msra.mxu0 %v530_v13  ;;  %503 = vmatpush1.bf16.xpose.msra.mxu1 %v530_v13 }
  0x46   :  { %272 = vmatprep.subr.bf16.mxu0 %v531_v14  ;;  %496 = vmatprep.subr.bf16.mxu1 %v531_v14 }
  0x4d   :  { %273 = vmatpush1.bf16.xpose.msra.mxu0 %v533_v15  ;;  %504 = vmatpush1.bf16.xpose.msra.mxu1 %v533_v15 }
  0x54   :  { %291 = vmatmul.mubr.bf16.vlgmr.msra.gmra.mrb[0].mxu0 %v512_v1  ;;  %323 = vmatmul.mubr.bf16.vlgmr.msra.gmra.mrb[0].mxu1 %v524_v9 }
  0x55   :  { %298 = vmatprep.mubr.bf16.mxu0 %v513_v2  ;;  %330 = vmatprep.mubr.bf16.mxu1 %v525_v10 }
  0x5c   :  { %299 = vmatmul.mubr.bf16.gmra.mrb[4].mxu0 %v515_v4  ;;  %331 = vmatmul.mubr.bf16.gmra.mrb[4].mxu1 %v527_v11 }
  0x5d   :  { %306 = vmatprep.mubr.bf16.mxu0 %v516_v5  ;;  %338 = vmatprep.mubr.bf16.mxu1 %v528_v12 }
  0x64   :  { %307 = vmatmul.mubr.bf16.gmra.mrb[8].mxu0 %v518_v6  ;;  %339 = vmatmul.mubr.bf16.gmra.mrb[8].mxu1 %v530_v13 }
  0x65   :  { %314 = vmatprep.mubr.bf16.mxu0 %v519_v7  ;;  %346 = vmatprep.mubr.bf16.mxu1 %v531_v14 }
  0x6c   :  { %315 = vmatmul.mubr.bf16.gmra.mrb[12].mxu0 %v521_v8  ;;  %347 = vmatmul.mubr.bf16.gmra.mrb[12].mxu1 %v533_v15 }
 0x127   :  { %v292_v16 = vpop.f32.mrb[0].mxu0  ;;  %v324_v17 = vpop.f32.mrb[0].mxu1 }
 0x128   :  { %v294_v18 = vpop.f32.mrb[1].mxu0  ;;  %v326_v19 = vpop.f32.mrb[1].mxu1  ;;  %v406_v22 = vmul.f32 0.00048828125, %v292_v16  ;;  %v414_v23 = vmul.f32 0.00048828125, %v324_v17 }
 0x129   :  { %v295_v20 = vpop.f32.mrb[2].mxu0  ;;  %v327_v21 = vpop.f32.mrb[2].mxu1 }
 0x12a   :  { %v297_v24 = vpop.f32.mrb[3].mxu0  ;;  %v329_v25 = vpop.f32.mrb[3].mxu1  ;;  %422 = vst [vmem:[#allocation5] sm:$0xff] %v406_v22  ;;  %430 = vst [vmem:[#allocation5 + $0x40] sm:$0xff] %v414_v23  ;;  %v407_v26 = vmul.f32 0.00048828125, %v295_v20  ;;  %v415_v27 = vmul.f32 0.00048828125, %v327_v21 }
 0x12c   :  { %423 = vst [vmem:[#allocation5 + $0x8] sm:$0xff] %v407_v26  ;;  %431 = vst [vmem:[#allocation5 + $0x48] sm:$0xff] %v415_v27 }
 0x12f   :  { %v300_v28 = vpop.f32.mrb[4].mxu0  ;;  %v332_v29 = vpop.f32.mrb[4].mxu1 }
 0x130   :  { %v302_v30 = vpop.f32.mrb[5].mxu0  ;;  %v334_v31 = vpop.f32.mrb[5].mxu1  ;;  %v408_v34 = vmul.f32 0.00048828125, %v300_v28  ;;  %v416_v35 = vmul.f32 0.00048828125, %v332_v29 }
 0x131   :  { %v303_v32 = vpop.f32.mrb[6].mxu0  ;;  %v335_v33 = vpop.f32.mrb[6].mxu1 }
 0x132   :  { %v305_v36 = vpop.f32.mrb[7].mxu0  ;;  %v337_v37 = vpop.f32.mrb[7].mxu1  ;;  %424 = vst [vmem:[#allocation5 + $0x10] sm:$0xff] %v408_v34  ;;  %432 = vst [vmem:[#allocation5 + $0x50] sm:$0xff] %v416_v35  ;;  %v409_v38 = vmul.f32 0.00048828125, %v303_v32  ;;  %v417_v39 = vmul.f32 0.00048828125, %v335_v33 }
 0x134   :  { %425 = vst [vmem:[#allocation5 + $0x18] sm:$0xff] %v409_v38  ;;  %433 = vst [vmem:[#allocation5 + $0x58] sm:$0xff] %v417_v39 }
 0x137   :  { %v308_v40 = vpop.f32.mrb[8].mxu0  ;;  %v340_v41 = vpop.f32.mrb[8].mxu1 }
 0x138   :  { %v310_v42 = vpop.f32.mrb[9].mxu0  ;;  %v342_v43 = vpop.f32.mrb[9].mxu1  ;;  %v410_v46 = vmul.f32 0.00048828125, %v308_v40  ;;  %v418_v47 = vmul.f32 0.00048828125, %v340_v41 }
 0x139   :  { %v311_v44 = vpop.f32.mrb[10].mxu0  ;;  %v343_v45 = vpop.f32.mrb[10].mxu1 }
 0x13a   :  { %v313_v48 = vpop.f32.mrb[11].mxu0  ;;  %v345_v49 = vpop.f32.mrb[11].mxu1  ;;  %426 = vst [vmem:[#allocation5 + $0x20] sm:$0xff] %v410_v46  ;;  %434 = vst [vmem:[#allocation5 + $0x60] sm:$0xff] %v418_v47  ;;  %v411_v50 = vmul.f32 0.00048828125, %v311_v44  ;;  %v419_v51 = vmul.f32 0.00048828125, %v343_v45 }
 0x13c   :  { %427 = vst [vmem:[#allocation5 + $0x28] sm:$0xff] %v411_v50  ;;  %435 = vst [vmem:[#allocation5 + $0x68] sm:$0xff] %v419_v51 }
 0x13f   :  { %v316_v52 = vpop.f32.mrb[12].mxu0  ;;  %v348_v53 = vpop.f32.mrb[12].mxu1 }
 0x140   :  { %v318_v54 = vpop.f32.mrb[13].mxu0  ;;  %v350_v55 = vpop.f32.mrb[13].mxu1  ;;  %v412_v58 = vmul.f32 0.00048828125, %v316_v52  ;;  %v420_v59 = vmul.f32 0.00048828125, %v348_v53 }
 0x141   :  { %v319_v56 = vpop.f32.mrb[14].mxu0  ;;  %v351_v57 = vpop.f32.mrb[14].mxu1 }
 0x142   :  { %v321_v60 = vpop.f32.mrb[15].mxu0  ;;  %v353_v61 = vpop.f32.mrb[15].mxu1  ;;  %428 = vst [vmem:[#allocation5 + $0x30] sm:$0xff] %v412_v58  ;;  %436 = vst [vmem:[#allocation5 + $0x70] sm:$0xff] %v420_v59  ;;  %v413_v62 = vmul.f32 0.00048828125, %v319_v56  ;;  %v421_v63 = vmul.f32 0.00048828125, %v351_v57 }
 0x144   :  { %429 = vst [vmem:[#allocation5 + $0x38] sm:$0xff] %v413_v62  ;;  %437 = vst [vmem:[#allocation5 + $0x78] sm:$0xff] %v421_v63 }
 0x145   :  { %567 = shalt.err (!%p564_p12)
}
 0x146   :  { %s568_s24 = scalar_lea.hbm %s627_s1, 2048 }
 0x147   :  { %p569_p13 = scmp.ne.s32.totalorder %s627_s1, %s568_s24  ;;  %p572_p0 = scmp.lt.u32.totalorder %s568_s24, %s627_s1 }
 0x149   :  { %p574_p1 = pnand %p572_p0, %p569_p13 }
 0x14b   :  { %577 = shalt.err (!%p574_p1)
}
 0x14c   :  { %449 = dma.vmem_to_hbm [thread:$0]  %s444_s20, 2048, %s627_s1, [#allocation4], %s583_s16, %s583_s16, %s584_s17  }
 0x14d   :  { %580 = dma.done.wait [#allocation4], 2048  }
 0x14e   :  { %581 = vsyncadd [#allocation4], 4294965248 }
 0x14f   :  { %453 = vsyncpa [#allocation3], 1 }
 0x150   :  { %454 = vsyncpa [#allocation4], 1 }

</bundles_post_ra>
